<compile_context>
chip_gen: v7x
topology: tpu7x:2x2x1
jax: 0.10.0
libtpu: 0.0.40
codegen_flags: <defaults>
</compile_context>

<pallas_src>
import math
from functools import partial

import jax
import jax.numpy as jnp
import numpy as np
from jax.experimental import pallas as pl
from jax.experimental.pallas import tpu as pltpu


# -----------------------------------------------------------------------------
# Kernels
# -----------------------------------------------------------------------------
def _layernorm_kernel(x_ref, g_ref, b_ref, o_ref, *, eps):
    x = x_ref[...]                                      # (N, D)
    mean = jnp.mean(x, axis=-1, keepdims=True)
    var = jnp.mean(jnp.square(x - mean), axis=-1, keepdims=True)
    inv = jax.lax.rsqrt(var + eps)
    o_ref[...] = ((x - mean) * inv * g_ref[...] + b_ref[...]).astype(o_ref.dtype)


def _linear_kernel(x_ref, w_ref, b_ref, *rest, activation, has_residual):
    # x:(N,Din) @ w:(Din,Dout) + b:(1,Dout), optional ReLU, optional fused
    # residual add (saves a separate elementwise kernel + extra HBM round-trip).
    if has_residual:
        res_ref, o_ref = rest
    else:
        (o_ref,) = rest
    y = jnp.dot(x_ref[...], w_ref[...], preferred_element_type=jnp.float32)
    y = y + b_ref[...]
    if activation == "relu":
        y = jnp.maximum(y, 0.0)
    if has_residual:
        y = y + res_ref[...]
    o_ref[...] = y.astype(o_ref.dtype)


def _attn_core_kernel(q_ref, k_ref, v_ref, mask_ref, o_ref, *, scale):
    # q,k,v: (B*H, S, dk); mask: (B*H, Sq, Sk) pre-broadcast (0 => masked).
    q = q_ref[...]
    k = k_ref[...]
    v = v_ref[...]
    s = jnp.einsum("bqd,bkd->bqk", q, k, preferred_element_type=jnp.float32) * scale
    s = jnp.where(mask_ref[...] == 0.0, jnp.float32(-1e9), s)
    s = s - jnp.max(s, axis=-1, keepdims=True)
    p = jnp.exp(s)
    denom = jnp.sum(p, axis=-1, keepdims=True)
    p = p * pl.reciprocal(denom, approx=False)
    o = jnp.einsum("bqk,bkd->bqd", p, v, preferred_element_type=jnp.float32)
    o_ref[...] = o.astype(o_ref.dtype)


# -----------------------------------------------------------------------------
# Pallas wrappers (single full-array blocks; shapes here are tiny so one block
# per call removes all per-grid-step overhead and masked-store penalties).
# -----------------------------------------------------------------------------
def layernorm(x, gamma, beta, eps=1e-5):
    N, D = x.shape
    return pl.pallas_call(
        partial(_layernorm_kernel, eps=eps),
        out_shape=jax.ShapeDtypeStruct((N, D), x.dtype),
        grid=(1,),
        in_specs=[
            pl.BlockSpec((N, D), lambda i: (0, 0)),
            pl.BlockSpec((1, D), lambda i: (0, 0)),
            pl.BlockSpec((1, D), lambda i: (0, 0)),
        ],
        out_specs=pl.BlockSpec((N, D), lambda i: (0, 0)),
        cost_estimate=pl.CostEstimate(
            flops=8 * N * D, transcendentals=N,
            bytes_accessed=4 * (2 * N * D + 2 * D)),
        compiler_params=pltpu.CompilerParams(dimension_semantics=("arbitrary",)),
    )(x, gamma, beta)


def linear(x, w, b, *, activation=None, residual=None):
    N, Din = x.shape
    Dout = w.shape[1]
    has_res = residual is not None
    in_specs = [
        pl.BlockSpec((N, Din), lambda i: (0, 0)),
        pl.BlockSpec((Din, Dout), lambda i: (0, 0)),
        pl.BlockSpec((1, Dout), lambda i: (0, 0)),
    ]
    args = [x, w, b]
    if has_res:
        in_specs.append(pl.BlockSpec((N, Dout), lambda i: (0, 0)))
        args.append(residual)
    bytes_accessed = 4 * (N * Din + Din * Dout + Dout
                          + (2 if has_res else 1) * N * Dout)
    return pl.pallas_call(
        partial(_linear_kernel, activation=activation, has_residual=has_res),
        out_shape=jax.ShapeDtypeStruct((N, Dout), x.dtype),
        grid=(1,),
        in_specs=in_specs,
        out_specs=pl.BlockSpec((N, Dout), lambda i: (0, 0)),
        cost_estimate=pl.CostEstimate(
            flops=2 * N * Din * Dout, transcendentals=0,
            bytes_accessed=bytes_accessed),
        compiler_params=pltpu.CompilerParams(dimension_semantics=("arbitrary",)),
    )(*args)


def attention_core(q, k, v, mask, d_k):
    BH, Sq, dk = q.shape
    Sk = k.shape[1]
    scale = 1.0 / math.sqrt(d_k)
    return pl.pallas_call(
        partial(_attn_core_kernel, scale=scale),
        out_shape=jax.ShapeDtypeStruct((BH, Sq, dk), q.dtype),
        grid=(1,),
        in_specs=[
            pl.BlockSpec((BH, Sq, dk), lambda i: (0, 0, 0)),
            pl.BlockSpec((BH, Sk, dk), lambda i: (0, 0, 0)),
            pl.BlockSpec((BH, Sk, dk), lambda i: (0, 0, 0)),
            pl.BlockSpec((BH, Sq, Sk), lambda i: (0, 0, 0)),
        ],
        out_specs=pl.BlockSpec((BH, Sq, dk), lambda i: (0, 0, 0)),
        cost_estimate=pl.CostEstimate(
            flops=4 * BH * Sq * Sk * dk,
            transcendentals=BH * Sq * Sk,
            bytes_accessed=4 * (2 * BH * Sq * dk + 2 * BH * Sk * dk + BH * Sq * Sk)),
        compiler_params=pltpu.CompilerParams(dimension_semantics=("arbitrary",)),
    )(q, k, v, mask)


# -----------------------------------------------------------------------------
# Module-level forward (glue in plain JAX: reshapes / transposes / broadcasts)
# -----------------------------------------------------------------------------
def multi_head_attention(q_in, k_in, v_in, mask, p, heads, residual=None):
    B, Sq, D = q_in.shape
    Sk = k_in.shape[1]
    dk = D // heads

    q = linear(q_in.reshape(B * Sq, D), p["wq"], p["bq"])
    k = linear(k_in.reshape(B * Sk, D), p["wk"], p["bk"])
    v = linear(v_in.reshape(B * Sk, D), p["wv"], p["bv"])

    q = q.reshape(B, Sq, heads, dk).transpose(0, 2, 1, 3).reshape(B * heads, Sq, dk)
    k = k.reshape(B, Sk, heads, dk).transpose(0, 2, 1, 3).reshape(B * heads, Sk, dk)
    v = v.reshape(B, Sk, heads, dk).transpose(0, 2, 1, 3).reshape(B * heads, Sk, dk)

    mask_b = jnp.broadcast_to(
        mask[:, None, :, :].astype(jnp.float32), (B, heads, Sq, Sk)
    ).reshape(B * heads, Sq, Sk)

    attn = attention_core(q, k, v, mask_b, dk)             # (B*H, Sq, dk)
    concat = attn.reshape(B, heads, Sq, dk).transpose(0, 2, 1, 3).reshape(B * Sq, D)

    res = None if residual is None else residual.reshape(B * Sq, D)
    out = linear(concat, p["wo"], p["bo"], residual=res)   # fused residual add
    return out.reshape(B, Sq, D)


def decoder_layer_forward(x, e_outputs, src_mask, trg_mask, params, heads):
    B, S, D = x.shape

    # sub-layer 1: masked self-attention
    x2 = layernorm(x.reshape(B * S, D), *params["ln1"]).reshape(B, S, D)
    x = multi_head_attention(x2, x2, x2, trg_mask, params["attn1"], heads, residual=x)

    # sub-layer 2: cross-attention over encoder outputs
    x2 = layernorm(x.reshape(B * S, D), *params["ln2"]).reshape(B, S, D)
    x = multi_head_attention(x2, e_outputs, e_outputs, src_mask, params["attn2"],
                             heads, residual=x)

    # sub-layer 3: feed-forward (ReLU MLP), residual fused into second matmul
    x2 = layernorm(x.reshape(B * S, D), *params["ln3"])
    h = linear(x2, params["ff"]["w1"], params["ff"]["b1"], activation="relu")
    out = linear(h, params["ff"]["w2"], params["ff"]["b2"],
                 residual=x.reshape(B * S, D))
    return out.reshape(B, S, D)


# -----------------------------------------------------------------------------
# Pure-JAX reference (mirrors the PyTorch module, dropout = identity)
# -----------------------------------------------------------------------------
def _layernorm_ref(x, g, b, eps=1e-5):
    mean = jnp.mean(x, -1, keepdims=True)
    var = jnp.mean(jnp.square(x - mean), -1, keepdims=True)
    return (x - mean) / jnp.sqrt(var + eps) * g + b


def _mha_ref(q_in, k_in, v_in, mask, p, heads):
    B, Sq, D = q_in.shape
    Sk = k_in.shape[1]
    dk = D // heads
    q = (q_in @ p["wq"] + p["bq"]).reshape(B, Sq, heads, dk).transpose(0, 2, 1, 3)
    k = (k_in @ p["wk"] + p["bk"]).reshape(B, Sk, heads, dk).transpose(0, 2, 1, 3)
    v = (v_in @ p["wv"] + p["bv"]).reshape(B, Sk, heads, dk).transpose(0, 2, 1, 3)
    scores = jnp.einsum("bhqd,bhkd->bhqk", q, k) / math.sqrt(dk)
    scores = jnp.where(mask[:, None, :, :] == 0, -1e9, scores)
    scores = jax.nn.softmax(scores, axis=-1)
    o = jnp.einsum("bhqk,bhkd->bhqd", scores, v)
    concat = o.transpose(0, 2, 1, 3).reshape(B, Sq, D)
    return concat @ p["wo"] + p["bo"]


def decoder_layer_ref(x, e_outputs, src_mask, trg_mask, params, heads):
    x2 = _layernorm_ref(x, *params["ln1"])
    x = x + _mha_ref(x2, x2, x2, trg_mask, params["attn1"], heads)
    x2 = _layernorm_ref(x, *params["ln2"])
    x = x + _mha_ref(x2, e_outputs, e_outputs, src_mask, params["attn2"], heads)
    x2 = _layernorm_ref(x, *params["ln3"])
    h = jnp.maximum(x2 @ params["ff"]["w1"] + params["ff"]["b1"], 0.0)
    return x + (h @ params["ff"]["w2"] + params["ff"]["b2"])


# -----------------------------------------------------------------------------
# Parameter construction
# -----------------------------------------------------------------------------
def init_params(key, d_model, heads, d_ff):
    def lin(k, din, dout):
        k1, k2 = jax.random.split(k)
        w = jax.random.normal(k1, (din, dout), jnp.float32) / math.sqrt(din)
        b = 0.02 * jax.random.normal(k2, (1, dout), jnp.float32)
        return w, b

    keys = jax.random.split(key, 16)

    def mha_params(ks):
        wq, bq = lin(ks[0], d_model, d_model)
        wk, bk = lin(ks[1], d_model, d_model)
        wv, bv = lin(ks[2], d_model, d_model)
        wo, bo = lin(ks[3], d_model, d_model)
        return dict(wq=wq, bq=bq, wk=wk, bk=bk, wv=wv, bv=bv, wo=wo, bo=bo)

    def ln_params(k):
        k1, k2 = jax.random.split(k)
        g = 1.0 + 0.1 * jax.random.normal(k1, (1, d_model), jnp.float32)
        b = 0.1 * jax.random.normal(k2, (1, d_model), jnp.float32)
        return (g, b)

    w1, b1 = lin(keys[8], d_model, d_ff)
    w2, b2 = lin(keys[9], d_ff, d_model)

    return {
        "ln1": ln_params(keys[10]),
        "ln2": ln_params(keys[11]),
        "ln3": ln_params(keys[12]),
        "attn1": mha_params(keys[0:4]),
        "attn2": mha_params(keys[4:8]),
        "ff": dict(w1=w1, b1=b1, w2=w2, b2=b2),
    }


# -----------------------------------------------------------------------------
if __name__ == "__main__":
    B, S, D, H, D_FF = 2, 8, 32, 4, 64

    key = jax.random.PRNGKey(0)
    k_x, k_e, k_p = jax.random.split(key, 3)

    x = jax.random.normal(k_x, (B, S, D), dtype=jnp.float32)
    e_outputs = jax.random.normal(k_e, (B, S, D), dtype=jnp.float32)

    # causal target mask (B, S, S); source mask (B, 1, S) with one padded slot
    trg_mask = jnp.broadcast_to(jnp.tril(jnp.ones((S, S), jnp.float32)), (B, S, S))
    src_mask = jnp.ones((B, 1, S), jnp.float32).at[1, 0, S - 1].set(0.0)

    params = init_params(k_p, D, H, D_FF)

    out = decoder_layer_forward(x, e_outputs, src_mask, trg_mask, params, H)
    out = jax.block_until_ready(out)

    with jax.default_matmul_precision("highest"):
        ref = decoder_layer_ref(x, e_outputs, src_mask, trg_mask, params, H)
    ref = jax.block_until_ready(ref)

    np.testing.assert_allclose(np.asarray(out), np.asarray(ref),
                               rtol=2e-4, atol=2e-4)

    print("KERNEL_OK")
</pallas_src>

<mosaic_0001>
module attributes {stable_mosaic.version = 11 : i64} {
  func.func @_layernorm_kernel(%arg0: i32, %arg1: memref<16x32xf32, #tpu.memory_space<vmem>>, %arg2: memref<1x32xf32, #tpu.memory_space<vmem>>, %arg3: memref<1x32xf32, #tpu.memory_space<vmem>>, %arg4: memref<16x32xf32, #tpu.memory_space<vmem>>) attributes {dimension_semantics = [#tpu.dimension_semantics<arbitrary>], iteration_bounds = array<i64: 1>, scalar_prefetch = 0 : i64, scratch_operands = 0 : i64, tpu.core_type = #tpu.core_type<tc>, window_params = [{pipeline_mode = #tpu.pipeline_mode<synchronous>, transform_indices = @transform_0, window_bounds = array<i64: 16, 32>}, {pipeline_mode = #tpu.pipeline_mode<synchronous>, transform_indices = @transform_1, window_bounds = array<i64: 1, 32>}, {pipeline_mode = #tpu.pipeline_mode<synchronous>, transform_indices = @transform_2, window_bounds = array<i64: 1, 32>}, {pipeline_mode = #tpu.pipeline_mode<synchronous>, transform_indices = @transform_3, window_bounds = array<i64: 16, 32>}]} {
    %c0 = arith.constant 0 : index
    %c0_0 = arith.constant 0 : index
    %0 = vector.load %arg1[%c0, %c0_0] : memref<16x32xf32, #tpu.memory_space<vmem>>, vector<16x32xf32>
    %cst = arith.constant dense<0.000000e+00> : vector<16xf32>
    %1 = vector.multi_reduction <add>, %0, %cst [1] : vector<16x32xf32> to vector<16xf32>
    %2 = vector.shape_cast %1 : vector<16xf32> to vector<16x1xf32>
    %cst_1 = arith.constant 3.200000e+01 : f32
    %3 = vector.broadcast %cst_1 : f32 to vector<16x1xf32>
    %4 = arith.divf %2, %3 : vector<16x1xf32>
    %5 = vector.broadcast %4 : vector<16x1xf32> to vector<16x32xf32>
    %6 = arith.subf %0, %5 : vector<16x32xf32>
    %7 = arith.mulf %6, %6 : vector<16x32xf32>
    %cst_2 = arith.constant dense<0.000000e+00> : vector<16xf32>
    %8 = vector.multi_reduction <add>, %7, %cst_2 [1] : vector<16x32xf32> to vector<16xf32>
    %9 = vector.shape_cast %8 : vector<16xf32> to vector<16x1xf32>
    %cst_3 = arith.constant 3.200000e+01 : f32
    %10 = vector.broadcast %cst_3 : f32 to vector<16x1xf32>
    %11 = arith.divf %9, %10 : vector<16x1xf32>
    %cst_4 = arith.constant 9.99999974E-6 : f32
    %12 = vector.broadcast %cst_4 : f32 to vector<16x1xf32>
    %13 = arith.addf %11, %12 : vector<16x1xf32>
    %14 = math.rsqrt %13 : vector<16x1xf32>
    %15 = vector.broadcast %4 : vector<16x1xf32> to vector<16x32xf32>
    %16 = arith.subf %0, %15 : vector<16x32xf32>
    %17 = vector.broadcast %14 : vector<16x1xf32> to vector<16x32xf32>
    %18 = arith.mulf %16, %17 : vector<16x32xf32>
    %c0_5 = arith.constant 0 : index
    %c0_6 = arith.constant 0 : index
    %19 = vector.load %arg2[%c0_5, %c0_6] : memref<1x32xf32, #tpu.memory_space<vmem>>, vector<1x32xf32>
    %20 = vector.broadcast %19 : vector<1x32xf32> to vector<16x32xf32>
    %21 = arith.mulf %18, %20 : vector<16x32xf32>
    %c0_7 = arith.constant 0 : index
    %c0_8 = arith.constant 0 : index
    %22 = vector.load %arg3[%c0_7, %c0_8] : memref<1x32xf32, #tpu.memory_space<vmem>>, vector<1x32xf32>
    %23 = vector.broadcast %22 : vector<1x32xf32> to vector<16x32xf32>
    %24 = arith.addf %21, %23 : vector<16x32xf32>
    %c0_9 = arith.constant 0 : index
    %c0_10 = arith.constant 0 : index
    %25 = vector.load %arg4[%c0_9, %c0_10] : memref<16x32xf32, #tpu.memory_space<vmem>>, vector<16x32xf32>
    tpu.vector_store %arg4[%c0_9, %c0_10], %24 {strides = array<i32>} : memref<16x32xf32, #tpu.memory_space<vmem>>, vector<16x32xf32>,
    return
  }
  func.func @transform_0(%arg0: i32) -> (i32, i32) {
    %c0_i32 = arith.constant 0 : i32
    %c0_i32_0 = arith.constant 0 : i32
    %c0_i32_1 = arith.constant 0 : i32
    return %c0_i32, %c0_i32_0 : i32, i32
  }
  func.func @transform_1(%arg0: i32) -> (i32, i32) {
    %c0_i32 = arith.constant 0 : i32
    %c0_i32_0 = arith.constant 0 : i32
    %c0_i32_1 = arith.constant 0 : i32
    return %c0_i32, %c0_i32_0 : i32, i32
  }
  func.func @transform_2(%arg0: i32) -> (i32, i32) {
    %c0_i32 = arith.constant 0 : i32
    %c0_i32_0 = arith.constant 0 : i32
    %c0_i32_1 = arith.constant 0 : i32
    return %c0_i32, %c0_i32_0 : i32, i32
  }
  func.func @transform_3(%arg0: i32) -> (i32, i32) {
    %c0_i32 = arith.constant 0 : i32
    %c0_i32_0 = arith.constant 0 : i32
    %c0_i32_1 = arith.constant 0 : i32
    return %c0_i32, %c0_i32_0 : i32, i32
  }
}

</mosaic_0001>

<bundles_post_ra>
// kernel: tpu_custom_call.1
= control target key start
LH: loop header
LB: loop body
LE: loop exit
PB: predicated region body
PF: predicated region fallthrough
CT: control target
= control target key end

     0   :  { %8 = vsyncpa [#allocation3], 0  ;;  %s220_s0 = inlined_call_operand.hbm [shape: f32[16,32], index: 0, kind: input, shape index: {}]   ;;  %s221_s1 = inlined_call_operand.vmem [shape: f32[1,32], index: 1, kind: input, shape index: {}]   ;;  %s222_s2 = inlined_call_operand.vmem [shape: f32[1,32], index: 2, kind: input, shape index: {}]   ;;  %s223_s3 = inlined_call_operand.hbm [shape: f32[16,32], index: 3, kind: output, shape index: {}]  }
   0x1   :  { %9 = vsyncpa [#allocation4], 0  ;;  %s154_s12 = smov [#allocation2]   ;;  %s106_s16 = scalar_lea.hbm %s220_s0, 256 }
   0x2   :  { %s15_s13 = sshll.u32 %s154_s12, 4  ;;  %p107_p0 = scmp.ne.s32.totalorder %s220_s0, %s106_s16  ;;  %s16_s13 = int_to_ptr.vmem [resolvable:$true] %s15_s13 }
   0x3   :  { %p110_p1 = scmp.lt.u32.totalorder %s106_s16, %s220_s0 }
   0x5   :  { %p112_p2 = pnand %p110_p1, %p107_p0 }
   0x7   :  { %115 = shalt.err (!%p112_p2)
}
   0x8   :  { %s116_s21 = scalar_lea.vmem %s16_s13, 256  ;;  %p121_p4 = scmp.lt.s32.totalorder %s16_s13, %s16_s13 }
   0x9   :  { %p117_p3 = scmp.ne.s32.totalorder %s16_s13, %s116_s21  ;;  %p122_p5 = scmp.lt.s32.totalorder %s116_s21, %s116_s21 }
   0xb   :  { %p123_p6 = por %p122_p5, %p121_p4 }
   0xd   :  { %p124_p7 = pnand %p123_p6, %p117_p3 }
   0xf   :  { %127 = shalt.err (!%p124_p7)
}
  0x10   :  { %s155_s22 = smov 128   ;;  %s156_s23 = smov 8  }
  0x11   :  { %21 = dma.hbm_to_vmem [thread:$0]  %s220_s0, 256, %s16_s13, [#allocation3], %s155_s22, %s155_s22, %s156_s23  }
  0x12   :  { %150 = dma.done.wait [#allocation3], 256  }
  0x13   :  { %151 = vsyncadd [#allocation3], 4294967040  ;;  %vm31_vm0 = vcmask 261120   ;;  %v29_v0 = vld [vmem:[#allocation2] sm:$0xff]  ;;  %v30_v1 = vld [vmem:[#allocation2 + $0x8] sm:$0xff]  ;;  %s157_s29 = smov [#allocation5]  }
  0x14   :  { %v32_v2 = vsel %vm31_vm0, %v29_v0, 0.0  ;;  %v35_v3 = vsel %vm31_vm0, %v30_v1, 0.0  ;;  %v96_v21 = vld [vmem:[%s221_s1] ss:$0 sm:$0xff]  ;;  %s84_s30 = sshll.u32 %s157_s29, 4  ;;  %s85_s30 = int_to_ptr.vmem [resolvable:$true] %s84_s30 }
  0x15   :  { %33 = vadd.xlane.f32.xlu0 %v32_v2  ;;  %v97_v23 = vld [vmem:[%s222_s2] ss:$0 sm:$0xff]  ;;  %s128_s4 = scalar_lea.vmem %s85_s30, 256  ;;  %p133_p9 = scmp.lt.s32.totalorder %s85_s30, %s85_s30 }
  0x16   :  { %p129_p8 = scmp.ne.s32.totalorder %s85_s30, %s128_s4  ;;  %p134_p10 = scmp.lt.s32.totalorder %s128_s4, %s128_s4 }
  0x18   :  { %p135_p11 = por %p134_p10, %p133_p9 }
  0x19   :  { %36 = vadd.xlane.f32.xlu0 %v35_v3 }
  0x1a   :  { %p136_p12 = pnand %p135_p11, %p129_p8 }
  0xa2   :  { %v34_v4 = vpop.xlane.xlu0 %33 }
  0xa3   :  { %v39_v5 = vmul.f32 0.03125, %v34_v4 }
  0xa5   :  { %v41_v6 = vsub.f32 %v29_v0, %v39_v5 }
  0xa6   :  { %v37_v7 = vpop.xlane.xlu0 %36 }
  0xa7   :  { %v40_v8 = vmul.f32 0.03125, %v37_v7  ;;  %v43_v9 = vmul.f32 %v41_v6, %v41_v6 }
  0xa9   :  { %v42_v10 = vsub.f32 %v30_v1, %v40_v8  ;;  %v45_v11 = vsel %vm31_vm0, %v43_v9, 0.0 }
  0xaa   :  { %46 = vadd.xlane.f32.xlu1 %v45_v11 }
  0xab   :  { %v44_v12 = vmul.f32 %v42_v10, %v42_v10 }
  0xad   :  { %v48_v13 = vsel %vm31_vm0, %v44_v12, 0.0 }
  0xae   :  { %49 = vadd.xlane.f32.xlu1 %v48_v13 }
 0x137   :  { %v47_v14 = vpop.xlane.xlu1 %46 }
 0x138   :  { %v51_v15 = vmul.f32 0.03125, %v47_v14 }
 0x13a   :  { %v53_v16 = vadd.f32 1e-05, %v51_v15 }
 0x13b   :  { %v50_v17 = vpop.xlane.xlu1 %49 }
 0x13c   :  { %102 = vrsqrt.f32 %v53_v16  ;;  %v52_v18 = vmul.f32 0.03125, %v50_v17 }
 0x13e   :  { %v54_v19 = vadd.f32 1e-05, %v52_v18 }
 0x140   :  { %104 = vrsqrt.f32 %v54_v19 }
 0x146   :  { %v103_v20 = vpop.eup %102 }
 0x147   :  { %v57_v22 = vmul.f32 %v103_v20, %v41_v6 }
 0x149   :  { %v66_v24 = vmul.f32 %v96_v21, %v57_v22 }
 0x14a   :  { %v105_v25 = vpop.eup %104 }
 0x14b   :  { %v58_v26 = vmul.f32 %v105_v25, %v42_v10  ;;  %v75_v27 = vadd.f32 %v97_v23, %v66_v24 }
 0x14d   :  { %v67_v28 = vmul.f32 %v96_v21, %v58_v26  ;;  %77 = vst.msk [vmem:[#allocation5] sm:$0xff] %vm31_vm0, %v75_v27 }
 0x14f   :  { %v76_v29 = vadd.f32 %v97_v23, %v67_v28 }
 0x151   :  { %78 = vst.msk [vmem:[#allocation5 + $0x8] sm:$0xff] %vm31_vm0, %v76_v29 }
 0x152   :  { %139 = shalt.err (!%p136_p12)
}
 0x153   :  { %s140_s5 = scalar_lea.hbm %s223_s3, 256 }
 0x154   :  { %p141_p13 = scmp.ne.s32.totalorder %s223_s3, %s140_s5  ;;  %p144_p0 = scmp.lt.u32.totalorder %s140_s5, %s223_s3 }
 0x156   :  { %p146_p1 = pnand %p144_p0, %p141_p13 }
 0x158   :  { %149 = shalt.err (!%p146_p1)
}
 0x159   :  { %90 = dma.vmem_to_hbm [thread:$0]  %s85_s30, 256, %s223_s3, [#allocation4], %s155_s22, %s155_s22, %s156_s23  }
 0x15a   :  { %152 = dma.done.wait [#allocation4], 256  }
 0x15b   :  { %153 = vsyncadd [#allocation4], 4294967040 }
 0x15c   :  { %94 = vsyncpa [#allocation3], 1 }
 0x15d   :  { %95 = vsyncpa [#allocation4], 1 }

</bundles_post_ra>
